<compile_context>
chip_gen: v7x
topology: tpu7x:2x2x1
jax: 0.10.0
libtpu: 0.0.40
codegen_flags: <defaults>
</compile_context>

<pallas_src>
import functools

import jax
import jax.numpy as jnp
from jax import lax
from jax.experimental import pallas as pl
from jax.experimental.pallas import tpu as pltpu


# ----------------------------------------------------------------------------
# Small helpers (host-side).
# ----------------------------------------------------------------------------
def _round_up(n, m):
    return -(-n // m) * m


def _pick_rows(dim, pref):
    # Largest row block <= pref that divides dim and is a multiple of 8,
    # else the full dim (a full-extent block is always legal).
    if dim <= pref:
        return dim
    for cand in range(pref, 7, -1):
        if dim % cand == 0 and cand % 8 == 0:
            return cand
    return dim


def _largest_divisor_leq(n, cap):
    for d in range(min(cap, n), 0, -1):
        if n % d == 0:
            return d
    return n


def _pad_gate_cols(w, h, hp):
    # Pad each PyTorch gate chunk [i, f, g, o] along the last dim from h to hp
    # (zero pad => padded gate lanes stay inert: c_pad stays 0, h_pad stays 0).
    if hp == h:
        return w
    pad = [(0, 0)] * (w.ndim - 1) + [(0, hp - h)]
    return jnp.concatenate(
        [jnp.pad(w[..., g * h:(g + 1) * h], pad) for g in range(4)], axis=-1)


def _sigmoid(x):
    # One EUP push (tanh) instead of exp + reciprocal per gate (exact identity).
    return 0.5 * (1.0 + jnp.tanh(0.5 * x))


# ----------------------------------------------------------------------------
# Kernel 1: BatchNorm1d statistics (training mode, biased variance) over the
# flattened (T*N, D) view, large row blocks.  A per-feature pivot (first row)
# stabilizes the single-pass variance.  Emits the folded affine (scale, shift).
# ----------------------------------------------------------------------------
def bn_stats_kernel(x_ref, gamma_ref, beta_ref, scale_ref, shift_ref,
                    sum_scr, ssq_scr, pivot_scr, *, count, eps):
    @pl.when(pl.program_id(0) == 0)
    def _():
        pivot_scr[...] = x_ref[0:1, :].astype(jnp.float32)
        sum_scr[...] = jnp.zeros_like(sum_scr)
        ssq_scr[...] = jnp.zeros_like(ssq_scr)

    xc = x_ref[...].astype(jnp.float32) - pivot_scr[...]        # (RB, D)
    sum_scr[...] += jnp.sum(xc, axis=0, keepdims=True)          # (1, D)
    ssq_scr[...] += jnp.sum(xc * xc, axis=0, keepdims=True)

    @pl.when(pl.program_id(0) == pl.num_programs(0) - 1)
    def _():
        inv_cnt = jnp.float32(1.0 / count)
        mean_c = sum_scr[...] * inv_cnt
        var = jnp.maximum(ssq_scr[...] * inv_cnt - mean_c * mean_c, 0.0)
        mean = pivot_scr[...] + mean_c
        scale = gamma_ref[...] * lax.rsqrt(var + eps)
        scale_ref[...] = scale
        shift_ref[...] = beta_ref[...] - mean * scale


# ----------------------------------------------------------------------------
# Kernel 2: fused input projection + LSTM recurrence.
#   grid = (batch blocks [parallel], time blocks [arbitrary]).
#   Per grid step: one (TB*NB, D)@(D, 4Hp) matmul fills gx_scr, then TB serial
#   steps of h @ W_hh^T + gate math.  h/c carries live in VMEM scratch (f32).
#   Gate order is PyTorch's [i, f, g, o], each padded to Hp lanes.
# ----------------------------------------------------------------------------
def fused_lstm_kernel(lens_smem_ref,                         # scalar prefetch
                      x_ref, weff_ref, beff_ref, whh_ref, lens_ref,
                      o_ref, h_scr, c_scr, gx_scr):
    b = pl.program_id(0)
    tblk = pl.program_id(1)
    TB, NB, D = x_ref.shape
    Hp = h_scr.shape[-1]
    t0 = tblk * TB

    @pl.when(tblk == 0)
    def _():
        h_scr[...] = jnp.zeros_like(h_scr)
        c_scr[...] = jnp.zeros_like(c_scr)

    # Lengths are sorted descending (pack_padded_sequence, enforce_sorted=True),
    # so the first row of the batch block carries the block's maximum length.
    blk_max_len = lens_smem_ref[b * NB]

    @pl.when(t0 >= blk_max_len)
    def _():
        # Entire time block is padding for this batch block: zero output, skip
        # all matmuls / gate math, leave h/c frozen.
        o_ref[...] = jnp.zeros_like(o_ref)

    @pl.when(t0 < blk_max_len)
    def _():
        # Hoisted input projection for the whole time block: one MXU matmul.
        x2d = x_ref[...].reshape(TB * NB, D).astype(weff_ref.dtype)
        gx_scr[...] = (jnp.dot(x2d, weff_ref[...],
                               preferred_element_type=jnp.float32)
                       + beff_ref[...])

        whh = whh_ref[...]                  # (Hp, 4Hp), VMEM resident
        lens = lens_ref[...]                # (NB, 1) int32

        def step(tb, carry):
            h, c = carry
            row0 = pl.multiple_of(tb * NB, NB)
            gates = (gx_scr[pl.ds(row0, NB), :]
                     + jnp.dot(h.astype(whh.dtype), whh,
                               preferred_element_type=jnp.float32))  # (NB, 4Hp)
            # Hp is a multiple of 128 -> all four slices are lane-aligned (free).
            i_g = _sigmoid(gates[:, 0 * Hp:1 * Hp])
            f_g = _sigmoid(gates[:, 1 * Hp:2 * Hp])
            g_g = jnp.tanh(gates[:, 2 * Hp:3 * Hp])
            o_g = _sigmoid(gates[:, 3 * Hp:4 * Hp])
            c_new = f_g * c + i_g * g_g
            h_new = o_g * jnp.tanh(c_new)
            valid = (t0 + tb) < lens                         # packed-seq mask
            h = jnp.where(valid, h_new, h)
            c = jnp.where(valid, c_new, c)
            o_ref[tb] = jnp.where(valid, h_new, 0.0).astype(o_ref.dtype)
            return h, c

        h, c = lax.fori_loop(0, TB, step, (h_scr[...], c_scr[...]),
                             unroll=min(8, TB))
        h_scr[...] = h
        c_scr[...] = c


# ----------------------------------------------------------------------------
# Wrapper (plain-JAX glue: BN fold, gate padding, pallas_call plumbing).
# ----------------------------------------------------------------------------
def batch_rnn_forward(x, output_lengths, params, *,
                      tb_time=None, nb_batch=None, bn_rows=512,
                      compute_dtype=jnp.float32, eps=1e-5):
    T, N, D = x.shape
    H = params["w_hh"].shape[1]
    Hp = _round_up(H, 128)            # lane-aligned gates / lane-dense output
    Gp = 4 * Hp
    NB = N if nb_batch is None else nb_batch          # default: no batch split
    TB = tb_time if tb_time is not None else _largest_divisor_leq(T, 32)
    assert N % NB == 0 and T % TB == 0
    assert NB == N or NB % 8 == 0, "batch block must be a multiple of 8"

    x = x.astype(jnp.float32)
    gamma = params["gamma"].reshape(1, D).astype(jnp.float32)
    beta = params["beta"].reshape(1, D).astype(jnp.float32)

    # --- 1. BN statistics over (T*N, D) with large row blocks ------------------
    M = T * N
    RB = _pick_rows(M, bn_rows)
    scale, shift = pl.pallas_call(
        functools.partial(bn_stats_kernel, count=float(M), eps=eps),
        out_shape=(jax.ShapeDtypeStruct((1, D), jnp.float32),
                   jax.ShapeDtypeStruct((1, D), jnp.float32)),
        grid_spec=pltpu.PrefetchScalarGridSpec(
            num_scalar_prefetch=0,
            grid=(M // RB,),
            in_specs=[
                pl.BlockSpec((RB, D), lambda r: (r, 0)),
                pl.BlockSpec((1, D), lambda r: (0, 0)),
                pl.BlockSpec((1, D), lambda r: (0, 0)),
            ],
            out_specs=[
                pl.BlockSpec((1, D), lambda r: (0, 0)),
                pl.BlockSpec((1, D), lambda r: (0, 0)),
            ],
            scratch_shapes=[pltpu.VMEM((1, D), jnp.float32),
                            pltpu.VMEM((1, D), jnp.float32),
                            pltpu.VMEM((1, D), jnp.float32)],
        ),
        compiler_params=pltpu.CompilerParams(
            dimension_semantics=("arbitrary",)),
    )(x.reshape(M, D), gamma, beta)

    # --- 2. Fold BN affine into the input projection; pad gates to Hp ---------
    wih_t = params["w_ih"].T.astype(jnp.float32)                 # (D, 4H)
    w_eff = wih_t * scale.reshape(D, 1)                          # (D, 4H)
    b_eff = shift @ wih_t + (params["b_ih"] + params["b_hh"]).reshape(1, 4 * H)
    whh_t = params["w_hh"].T.astype(jnp.float32)                 # (H, 4H)

    w_eff = _pad_gate_cols(w_eff, H, Hp).astype(compute_dtype)   # (D, Gp)
    b_eff = _pad_gate_cols(b_eff, H, Hp).astype(jnp.float32)     # (1, Gp)
    whh_p = jnp.pad(_pad_gate_cols(whh_t, H, Hp),
                    ((0, Hp - H), (0, 0))).astype(compute_dtype) # (Hp, Gp)

    lens_i32 = output_lengths.astype(jnp.int32).reshape(N)
    lens_2d = lens_i32.reshape(N, 1)
    x_in = x.astype(compute_dtype)

    # VMEM budget (x/out double-buffered, weights single-buffered) + headroom.
    csize = jnp.dtype(compute_dtype).itemsize
    vmem_est = (2 * TB * NB * D * csize
                + 2 * TB * NB * Hp * 4
                + (D + Hp) * Gp * csize + Gp * 4
                + 2 * NB * Hp * 4
                + TB * NB * Gp * 4
                + (1 << 20))
    vmem_limit = int(max(32 << 20, min(2 * vmem_est, 100 << 20)))

    # --- 3. Fused projection + recurrence --------------------------------------
    out = pl.pallas_call(
        fused_lstm_kernel,
        out_shape=jax.ShapeDtypeStruct((T, N, Hp), jnp.float32),
        grid_spec=pltpu.PrefetchScalarGridSpec(
            num_scalar_prefetch=1,                     # lengths -> SMEM
            grid=(N // NB, T // TB),                   # batch outer, time inner
            in_specs=[
                pl.BlockSpec((TB, NB, D), lambda b, t, lens: (t, b, 0)),
                # Constant-index weight blocks: single-buffered to save VMEM.
                pl.BlockSpec((D, Gp), lambda b, t, lens: (0, 0),
                             pipeline_mode=pl.Buffered(1)),
                pl.BlockSpec((1, Gp), lambda b, t, lens: (0, 0),
                             pipeline_mode=pl.Buffered(1)),
                pl.BlockSpec((Hp, Gp), lambda b, t, lens: (0, 0),
                             pipeline_mode=pl.Buffered(1)),
                pl.BlockSpec((NB, 1), lambda b, t, lens: (b, 0)),
            ],
            out_specs=pl.BlockSpec((TB, NB, Hp), lambda b, t, lens: (t, b, 0)),
            scratch_shapes=[
                pltpu.VMEM((NB, Hp), jnp.float32),           # h carry
                pltpu.VMEM((NB, Hp), jnp.float32),           # c carry
                pltpu.VMEM((TB * NB, Gp), jnp.float32),      # per-block gates_x
            ],
        ),
        compiler_params=pltpu.CompilerParams(
            # Batch axis parallel (only pays on 2-TC v7x); time serial.
            dimension_semantics=("parallel", "arbitrary"),
            vmem_limit_bytes=vmem_limit),
    )(lens_i32, x_in, w_eff, b_eff, whh_p, lens_2d)

    return out[:, :, :H] if Hp != H else out


# ----------------------------------------------------------------------------
# Pure-JAX reference (mirrors PyTorch BatchRNN.forward) for correctness check.
# ----------------------------------------------------------------------------
def ref_forward(x, lengths, params):
    T, N, D = x.shape
    H = params["w_hh"].shape[1]
    xf = x.reshape(T * N, D)
    mean = xf.mean(0)
    var = ((xf - mean) ** 2).mean(0)
    xn = (xf - mean) / jnp.sqrt(var + 1e-5) * params["gamma"] + params["beta"]
    xn = xn.reshape(T, N, D)

    h = jnp.zeros((N, H), jnp.float32)
    c = jnp.zeros((N, H), jnp.float32)
    outs = []
    for t in range(T):
        gates = (xn[t] @ params["w_ih"].T + params["b_ih"]
                 + h @ params["w_hh"].T + params["b_hh"])
        i_g = jax.nn.sigmoid(gates[:, :H])
        f_g = jax.nn.sigmoid(gates[:, H:2 * H])
        g_g = jnp.tanh(gates[:, 2 * H:3 * H])
        o_g = jax.nn.sigmoid(gates[:, 3 * H:])
        c_new = f_g * c + i_g * g_g
        h_new = o_g * jnp.tanh(c_new)
        valid = (t < lengths)[:, None]
        h = jnp.where(valid, h_new, h)
        c = jnp.where(valid, c_new, c)
        outs.append(jnp.where(valid, h_new, 0.0))
    return jnp.stack(outs, axis=0)


if __name__ == "__main__":
    # T=8 timesteps, N=16 batch, input_size=32, hidden=32 (padded to 128 lanes).
    T, N, D, H = 8, 16, 32, 32
    key = jax.random.PRNGKey(0)
    kx, kg, kb, k1, k2, k3, k4 = jax.random.split(key, 7)

    x = jax.random.normal(kx, (T, N, D), dtype=jnp.float32)
    # pack_padded_sequence(enforce_sorted=True) expects descending lengths.
    # Second half of the batch has max length 4 so the demo exercises the
    # "skip fully-padded time block" path (nb_batch=8, tb_time=4 below).
    output_lengths = jnp.array([8, 8, 8, 7, 7, 6, 6, 5, 4, 4, 3, 3, 2, 2, 1, 1],
                               dtype=jnp.int32)

    # Deterministic parameter init (PyTorch LSTM: U(-1/sqrt(H), 1/sqrt(H))).
    s = 1.0 / (H ** 0.5)
    params = {
        "gamma": 1.0 + 0.1 * jax.random.normal(kg, (D,), dtype=jnp.float32),
        "beta": 0.1 * jax.random.normal(kb, (D,), dtype=jnp.float32),
        "w_ih": jax.random.uniform(k1, (4 * H, D), jnp.float32, -s, s),
        "w_hh": jax.random.uniform(k2, (4 * H, H), jnp.float32, -s, s),
        "b_ih": jax.random.uniform(k3, (4 * H,), jnp.float32, -s, s),
        "b_hh": jax.random.uniform(k4, (4 * H,), jnp.float32, -s, s),
    }

    # Production defaults are nb_batch=None (no batch split) and a larger
    # tb_time; the demo splits to exercise carries, masking and block skipping.
    out = batch_rnn_forward(x, output_lengths, params,
                            tb_time=4, nb_batch=8,
                            compute_dtype=jnp.float32)
    out = jax.block_until_ready(out)

    ref = ref_forward(x, output_lengths, params)
    err = float(jnp.max(jnp.abs(out - ref)))
    assert out.shape == (T, N, H), out.shape
    assert err < 1e-3, f"max abs error {err}"
    print("KERNEL_OK")
</pallas_src>

<mosaic_0001>
module attributes {stable_mosaic.version = 11 : i64} {
  func.func @bn_stats_kernel(%arg0: i32, %arg1: memref<128x32xf32, #tpu.memory_space<vmem>>, %arg2: memref<1x32xf32, #tpu.memory_space<vmem>>, %arg3: memref<1x32xf32, #tpu.memory_space<vmem>>, %arg4: memref<1x32xf32, #tpu.memory_space<vmem>>, %arg5: memref<1x32xf32, #tpu.memory_space<vmem>>, %arg6: memref<1x32xf32, #tpu.memory_space<vmem>>, %arg7: memref<1x32xf32, #tpu.memory_space<vmem>>, %arg8: memref<1x32xf32, #tpu.memory_space<vmem>>) attributes {dimension_semantics = [#tpu.dimension_semantics<arbitrary>], iteration_bounds = array<i64: 1>, scalar_prefetch = 0 : i64, scratch_operands = 3 : i64, tpu.core_type = #tpu.core_type<tc>, window_params = [{transform_indices = @transform_0, window_bounds = array<i64: 128, 32>}, {pipeline_mode = #tpu.pipeline_mode<synchronous>, transform_indices = @transform_1, window_bounds = array<i64: 1, 32>}, {pipeline_mode = #tpu.pipeline_mode<synchronous>, transform_indices = @transform_2, window_bounds = array<i64: 1, 32>}, {pipeline_mode = #tpu.pipeline_mode<synchronous>, transform_indices = @transform_3, window_bounds = array<i64: 1, 32>}, {pipeline_mode = #tpu.pipeline_mode<synchronous>, transform_indices = @transform_4, window_bounds = array<i64: 1, 32>}]} {
    %c0_i32 = arith.constant 0 : i32
    %0 = arith.cmpi eq, %arg0, %c0_i32 : i32
    %1 = arith.extui %0 : i1 to i32
    %c0_i32_0 = arith.constant 0 : i32
    %2 = arith.cmpi ne, %1, %c0_i32_0 : i32
    scf.if %2 {
      %c0_15 = arith.constant 0 : index
      %c0_16 = arith.constant 0 : index
      %21 = vector.load %arg1[%c0_15, %c0_16] : memref<128x32xf32, #tpu.memory_space<vmem>>, vector<1x32xf32>
      %c0_17 = arith.constant 0 : index
      %c0_18 = arith.constant 0 : index
      %22 = vector.load %arg8[%c0_17, %c0_18] : memref<1x32xf32, #tpu.memory_space<vmem>>, vector<1x32xf32>
      tpu.vector_store %arg8[%c0_17, %c0_18], %21 {strides = array<i32>} : memref<1x32xf32, #tpu.memory_space<vmem>>, vector<1x32xf32>,
      %cst_19 = arith.constant 0.000000e+00 : f32
      %23 = vector.broadcast %cst_19 : f32 to vector<1x32xf32>
      %c0_20 = arith.constant 0 : index
      %c0_21 = arith.constant 0 : index
      %24 = vector.load %arg6[%c0_20, %c0_21] : memref<1x32xf32, #tpu.memory_space<vmem>>, vector<1x32xf32>
      tpu.vector_store %arg6[%c0_20, %c0_21], %23 {strides = array<i32>} : memref<1x32xf32, #tpu.memory_space<vmem>>, vector<1x32xf32>,
      %cst_22 = arith.constant 0.000000e+00 : f32
      %25 = vector.broadcast %cst_22 : f32 to vector<1x32xf32>
      %c0_23 = arith.constant 0 : index
      %c0_24 = arith.constant 0 : index
      %26 = vector.load %arg7[%c0_23, %c0_24] : memref<1x32xf32, #tpu.memory_space<vmem>>, vector<1x32xf32>
      tpu.vector_store %arg7[%c0_23, %c0_24], %25 {strides = array<i32>} : memref<1x32xf32, #tpu.memory_space<vmem>>, vector<1x32xf32>,
    } else {
    }
    %c0 = arith.constant 0 : index
    %c0_1 = arith.constant 0 : index
    %3 = vector.load %arg1[%c0, %c0_1] : memref<128x32xf32, #tpu.memory_space<vmem>>, vector<128x32xf32>
    %c0_2 = arith.constant 0 : index
    %c0_3 = arith.constant 0 : index
    %4 = vector.load %arg8[%c0_2, %c0_3] : memref<1x32xf32, #tpu.memory_space<vmem>>, vector<1x32xf32>
    %5 = vector.broadcast %4 : vector<1x32xf32> to vector<128x32xf32>
    %6 = arith.subf %3, %5 : vector<128x32xf32>
    %c0_4 = arith.constant 0 : index
    %c0_5 = arith.constant 0 : index
    %7 = vector.load %arg6[%c0_4, %c0_5] : memref<1x32xf32, #tpu.memory_space<vmem>>, vector<1x32xf32>
    %cst = arith.constant dense<0.000000e+00> : vector<32xf32>
    %8 = vector.multi_reduction <add>, %6, %cst [0] : vector<128x32xf32> to vector<32xf32>
    %9 = vector.shape_cast %8 : vector<32xf32> to vector<1x32xf32>
    %10 = arith.addf %7, %9 : vector<1x32xf32>
    %c0_6 = arith.constant 0 : index
    %c0_7 = arith.constant 0 : index
    %11 = vector.load %arg6[%c0_6, %c0_7] : memref<1x32xf32, #tpu.memory_space<vmem>>, vector<1x32xf32>
    tpu.vector_store %arg6[%c0_6, %c0_7], %10 {strides = array<i32>} : memref<1x32xf32, #tpu.memory_space<vmem>>, vector<1x32xf32>,
    %c0_8 = arith.constant 0 : index
    %c0_9 = arith.constant 0 : index
    %12 = vector.load %arg7[%c0_8, %c0_9] : memref<1x32xf32, #tpu.memory_space<vmem>>, vector<1x32xf32>
    %13 = arith.mulf %6, %6 : vector<128x32xf32>
    %cst_10 = arith.constant dense<0.000000e+00> : vector<32xf32>
    %14 = vector.multi_reduction <add>, %13, %cst_10 [0] : vector<128x32xf32> to vector<32xf32>
    %15 = vector.shape_cast %14 : vector<32xf32> to vector<1x32xf32>
    %16 = arith.addf %12, %15 : vector<1x32xf32>
    %c0_11 = arith.constant 0 : index
    %c0_12 = arith.constant 0 : index
    %17 = vector.load %arg7[%c0_11, %c0_12] : memref<1x32xf32, #tpu.memory_space<vmem>>, vector<1x32xf32>
    tpu.vector_store %arg7[%c0_11, %c0_12], %16 {strides = array<i32>} : memref<1x32xf32, #tpu.memory_space<vmem>>, vector<1x32xf32>,
    %c0_i32_13 = arith.constant 0 : i32
    %18 = arith.cmpi eq, %arg0, %c0_i32_13 : i32
    %19 = arith.extui %18 : i1 to i32
    %c0_i32_14 = arith.constant 0 : i32
    %20 = arith.cmpi ne, %19, %c0_i32_14 : i32
    scf.if %20 {
      %c0_15 = arith.constant 0 : index
      %c0_16 = arith.constant 0 : index
      %21 = vector.load %arg6[%c0_15, %c0_16] : memref<1x32xf32, #tpu.memory_space<vmem>>, vector<1x32xf32>
      %cst_17 = arith.constant 7.812500e-03 : f32
      %22 = vector.broadcast %cst_17 : f32 to vector<1x32xf32>
      %23 = arith.mulf %21, %22 : vector<1x32xf32>
      %c0_18 = arith.constant 0 : index
      %c0_19 = arith.constant 0 : index
      %24 = vector.load %arg7[%c0_18, %c0_19] : memref<1x32xf32, #tpu.memory_space<vmem>>, vector<1x32xf32>
      %cst_20 = arith.constant 7.812500e-03 : f32
      %25 = vector.broadcast %cst_20 : f32 to vector<1x32xf32>
      %26 = arith.mulf %24, %25 : vector<1x32xf32>
      %27 = arith.mulf %23, %23 : vector<1x32xf32>
      %28 = arith.subf %26, %27 : vector<1x32xf32>
      %cst_21 = arith.constant 0.000000e+00 : f32
      %29 = vector.broadcast %cst_21 : f32 to vector<1x32xf32>
      %30 = arith.maximumf %28, %29 : vector<1x32xf32>
      %c0_22 = arith.constant 0 : index
      %c0_23 = arith.constant 0 : index
      %31 = vector.load %arg8[%c0_22, %c0_23] : memref<1x32xf32, #tpu.memory_space<vmem>>, vector<1x32xf32>
      %32 = arith.addf %31, %23 : vector<1x32xf32>
      %c0_24 = arith.constant 0 : index
      %c0_25 = arith.constant 0 : index
      %33 = vector.load %arg2[%c0_24, %c0_25] : memref<1x32xf32, #tpu.memory_space<vmem>>, vector<1x32xf32>
      %cst_26 = arith.constant 9.99999974E-6 : f32
      %34 = vector.broadcast %cst_26 : f32 to vector<1x32xf32>
      %35 = arith.addf %30, %34 : vector<1x32xf32>
      %36 = math.rsqrt %35 : vector<1x32xf32>
      %37 = arith.mulf %33, %36 : vector<1x32xf32>
      %c0_27 = arith.constant 0 : index
      %c0_28 = arith.constant 0 : index
      %38 = vector.load %arg4[%c0_27, %c0_28] : memref<1x32xf32, #tpu.memory_space<vmem>>, vector<1x32xf32>
      tpu.vector_store %arg4[%c0_27, %c0_28], %37 {strides = array<i32>} : memref<1x32xf32, #tpu.memory_space<vmem>>, vector<1x32xf32>,
      %c0_29 = arith.constant 0 : index
      %c0_30 = arith.constant 0 : index
      %39 = vector.load %arg3[%c0_29, %c0_30] : memref<1x32xf32, #tpu.memory_space<vmem>>, vector<1x32xf32>
      %40 = arith.mulf %32, %37 : vector<1x32xf32>
      %41 = arith.subf %39, %40 : vector<1x32xf32>
      %c0_31 = arith.constant 0 : index
      %c0_32 = arith.constant 0 : index
      %42 = vector.load %arg5[%c0_31, %c0_32] : memref<1x32xf32, #tpu.memory_space<vmem>>, vector<1x32xf32>
      tpu.vector_store %arg5[%c0_31, %c0_32], %41 {strides = array<i32>} : memref<1x32xf32, #tpu.memory_space<vmem>>, vector<1x32xf32>,
    } else {
    }
    return
  }
  func.func @transform_0(%arg0: i32) -> (i32, i32) {
    %c0_i32 = arith.constant 0 : i32
    %c0_i32_0 = arith.constant 0 : i32
    return %arg0, %c0_i32 : i32, i32
  }
  func.func @transform_1(%arg0: i32) -> (i32, i32) {
    %c0_i32 = arith.constant 0 : i32
    %c0_i32_0 = arith.constant 0 : i32
    %c0_i32_1 = arith.constant 0 : i32
    return %c0_i32, %c0_i32_0 : i32, i32
  }
  func.func @transform_2(%arg0: i32) -> (i32, i32) {
    %c0_i32 = arith.constant 0 : i32
    %c0_i32_0 = arith.constant 0 : i32
    %c0_i32_1 = arith.constant 0 : i32
    return %c0_i32, %c0_i32_0 : i32, i32
  }
  func.func @transform_3(%arg0: i32) -> (i32, i32) {
    %c0_i32 = arith.constant 0 : i32
    %c0_i32_0 = arith.constant 0 : i32
    %c0_i32_1 = arith.constant 0 : i32
    return %c0_i32, %c0_i32_0 : i32, i32
  }
  func.func @transform_4(%arg0: i32) -> (i32, i32) {
    %c0_i32 = arith.constant 0 : i32
    %c0_i32_0 = arith.constant 0 : i32
    %c0_i32_1 = arith.constant 0 : i32
    return %c0_i32, %c0_i32_0 : i32, i32
  }
}

</mosaic_0001>

<bundles_post_ra>
// kernel: tpu_custom_call.1
= control target key start
LH: loop header
LB: loop body
LE: loop exit
PB: predicated region body
PF: predicated region fallthrough
CT: control target
= control target key end

     0   :  { %10 = vsyncpa [#allocation6], 0  ;;  %vm23_vm0 = vcmask 253952   ;;  %v267_v1 = vmov 0.0   ;;  %s433_s0 = inlined_call_operand.vmem [shape: f32[128,32], index: 0, kind: input, shape index: {}]   ;;  %s434_s1 = inlined_call_operand.vmem [shape: f32[1,32], index: 1, kind: input, shape index: {}]   ;;  %s435_s2 = inlined_call_operand.vmem [shape: f32[1,32], index: 2, kind: input, shape index: {}]   ;;  %s436_s3 = inlined_call_operand.hbm [shape: f32[1,32], index: 3, kind: output, shape index: {0}]   ;;  %s437_s4 = inlined_call_operand.hbm [shape: f32[1,32], index: 4, kind: output, shape index: {1}]  }
   0x1   :  { %v22_v0 = vld [vmem:[%s433_s0] sm:$0x1]  ;;  %25 = vst.msk [vmem:[#allocation2] sm:$0x1] %vm23_vm0, %v267_v1  ;;  %26 = vst.msk [vmem:[#allocation3] sm:$0x1] %vm23_vm0, %v267_v1 }
   0x2   :  { %24 = vst.msk [vmem:[#allocation4] sm:$0x1] %vm23_vm0, %v22_v0  ;;  %v27_v2 = vld [vmem:[%s433_s0] sm:$0xff]  ;;  %v28_v3 = vld [vmem:[%s433_s0 + $0x8] sm:$0xff] }
   0x3   :  { %11 = vsyncpa [#allocation8], 0  ;;  %v29_v5 = vld [vmem:[%s433_s0 + $0x10] sm:$0xff]  ;;  %v30_v8 = vld [vmem:[%s433_s0 + $0x18] sm:$0xff]  ;;  %vm67_vm1 = vcmask 261120   ;;  %s268_s24 = smov [#allocation5]  }
   0x4   :  { %v31_v10 = vld [vmem:[%s433_s0 + $0x20] sm:$0xff]  ;;  %v32_v14 = vld [vmem:[%s433_s0 + $0x28] sm:$0xff]  ;;  %v33_v18 = vld [vmem:[%s433_s0 + $0x30] sm:$0xff]  ;;  %s191_s25 = sshll.u32 %s268_s24, 4  ;;  %s269_s28 = smov [#allocation7]   ;;  %s192_s25 = int_to_ptr.vmem [resolvable:$true] %s191_s25 }
   0x5   :  { %v34_v22 = vld [vmem:[%s433_s0 + $0x38] sm:$0xff]  ;;  %v35_v28 = vld [vmem:[%s433_s0 + $0x40] sm:$0xff]  ;;  %v36_v33 = vld [vmem:[%s433_s0 + $0x48] sm:$0xff]  ;;  %s201_s29 = sshll.u32 %s269_s28, 4  ;;  %s219_s30 = scalar_lea.vmem %s192_s25, 16  ;;  %s202_s29 = int_to_ptr.vmem [resolvable:$true] %s201_s29 }
   0x6   :  { %v37_v41 = vld [vmem:[%s433_s0 + $0x50] sm:$0xff]  ;;  %v38_v48 = vld [vmem:[%s433_s0 + $0x58] sm:$0xff]  ;;  %v39_v55 = vld [vmem:[%s433_s0 + $0x60] sm:$0xff]  ;;  %p220_p0 = scmp.ne.s32.totalorder %s192_s25, %s219_s30  ;;  %s223_s5 = scalar_lea.vmem %s192_s25, 32 }
   0x7   :  { %v40_v62 = vld [vmem:[%s433_s0 + $0x68] sm:$0xff]  ;;  %p224_p1 = scmp.lt.s32.totalorder %s192_s25, %s192_s25  ;;  %p225_p2 = scmp.lt.s32.totalorder %s223_s5, %s219_s30 }
   0x9   :  { %v307_v4 = vld [vmem:[#allocation4] ss:$0 sm:$0xff]  ;;  %p226_p3 = por %p225_p2, %p224_p1 }
   0xa   :  { %v50_v6 = vsub.f32 %v27_v2, %v307_v4  ;;  %v51_v7 = vsub.f32 %v28_v3, %v307_v4  ;;  %v52_v9 = vsub.f32 %v29_v5, %v307_v4  ;;  %v53_v11 = vsub.f32 %v30_v8, %v307_v4 }
   0xb   :  { %v54_v16 = vsub.f32 %v31_v10, %v307_v4  ;;  %v55_v20 = vsub.f32 %v32_v14, %v307_v4  ;;  %v56_v26 = vsub.f32 %v33_v18, %v307_v4  ;;  %v57_v31 = vsub.f32 %v34_v22, %v307_v4  ;;  %p227_p4 = pnand %p226_p3, %p220_p0 }
   0xc   :  { %v68_v12 = vsel %vm67_vm1, %v50_v6, 0.0  ;;  %v69_v13 = vsel %vm67_vm1, %v51_v7, 0.0  ;;  %v71_v17 = vsel %vm67_vm1, %v52_v9, 0.0  ;;  %v73_v21 = vsel %vm67_vm1, %v53_v11, 0.0 }
   0xd   :  { %v70_v15 = vadd.f32 %v69_v13, %v68_v12  ;;  %v109_v24 = vmul.f32 %v50_v6, %v50_v6  ;;  %v110_v25 = vmul.f32 %v51_v7, %v51_v7  ;;  %v75_v27 = vsel %vm67_vm1, %v54_v16, 0.0  ;;  %v41_v6 = vld [vmem:[%s433_s0 + $0x70] sm:$0xff]  ;;  %v42_v13 = vld [vmem:[%s433_s0 + $0x78] sm:$0xff] }
   0xe   :  { %v111_v30 = vmul.f32 %v52_v9, %v52_v9  ;;  %v77_v32 = vsel %vm67_vm1, %v55_v20, 0.0  ;;  %v112_v35 = vmul.f32 %v53_v11, %v53_v11  ;;  %v58_v38 = vsub.f32 %v35_v28, %v307_v4 }
   0xf   :  { %v72_v19 = vadd.f32 %v71_v17, %v70_v15  ;;  %v125_v36 = vsel %vm67_vm1, %v109_v24, 0.0  ;;  %v126_v37 = vsel %vm67_vm1, %v110_v25, 0.0  ;;  %v79_v39 = vsel %vm67_vm1, %v56_v26, 0.0 }
  0x10   :  { %v127_v40 = vadd.f32 %v126_v37, %v125_v36  ;;  %v113_v43 = vmul.f32 %v54_v16, %v54_v16  ;;  %v128_v44 = vsel %vm67_vm1, %v111_v30, 0.0  ;;  %v59_v45 = vsub.f32 %v36_v33, %v307_v4 }
  0x11   :  { %v74_v23 = vadd.f32 %v73_v21, %v72_v19  ;;  %v81_v46 = vsel %vm67_vm1, %v57_v31, 0.0  ;;  %v114_v50 = vmul.f32 %v55_v20, %v55_v20  ;;  %v130_v51 = vsel %vm67_vm1, %v112_v35, 0.0 }
  0x12   :  { %v129_v47 = vadd.f32 %v128_v44, %v127_v40  ;;  %v60_v52 = vsub.f32 %v37_v41, %v307_v4  ;;  %v83_v53 = vsel %vm67_vm1, %v58_v38, 0.0  ;;  %v115_v57 = vmul.f32 %v56_v26, %v56_v26 }
  0x13   :  { %v76_v29 = vadd.f32 %v75_v27, %v74_v23  ;;  %v132_v58 = vsel %vm67_vm1, %v113_v43, 0.0  ;;  %v61_v59 = vsub.f32 %v38_v48, %v307_v4  ;;  %v85_v60 = vsel %vm67_vm1, %v59_v45, 0.0 }
  0x14   :  { %v131_v54 = vadd.f32 %v130_v51, %v129_v47  ;;  %v116_v0 = vmul.f32 %v57_v31, %v57_v31  ;;  %v134_v1 = vsel %vm67_vm1, %v114_v50, 0.0  ;;  %v62_v2 = vsub.f32 %v39_v55, %v307_v4 }
  0x15   :  { %v78_v34 = vadd.f32 %v77_v32, %v76_v29  ;;  %v87_v3 = vsel %vm67_vm1, %v60_v52, 0.0  ;;  %v117_v8 = vmul.f32 %v58_v38, %v58_v38  ;;  %v136_v9 = vsel %vm67_vm1, %v115_v57, 0.0 }
  0x16   :  { %v133_v61 = vadd.f32 %v132_v58, %v131_v54  ;;  %v63_v10 = vsub.f32 %v40_v62, %v307_v4  ;;  %v89_v11 = vsel %vm67_vm1, %v61_v59, 0.0  ;;  %v118_v15 = vmul.f32 %v59_v45, %v59_v45  ;;  %v66_v54 = vld [vmem:[#allocation2] sm:$0x1]  ;;  %v108_v62 = vld [vmem:[#allocation3] sm:$0x1] }
  0x17   :  { %v80_v42 = vadd.f32 %v79_v39, %v78_v34  ;;  %v138_v16 = vsel %vm67_vm1, %v116_v0, 0.0  ;;  %v64_v17 = vsub.f32 %v41_v6, %v307_v4  ;;  %v91_v18 = vsel %vm67_vm1, %v62_v2, 0.0 }
  0x18   :  { %v135_v5 = vadd.f32 %v134_v1, %v133_v61  ;;  %v119_v21 = vmul.f32 %v60_v52, %v60_v52  ;;  %v140_v22 = vsel %vm67_vm1, %v117_v8, 0.0  ;;  %v65_v23 = vsub.f32 %v42_v13, %v307_v4 }
  0x19   :  { %v82_v49 = vadd.f32 %v81_v46, %v80_v42  ;;  %v93_v24 = vsel %vm67_vm1, %v63_v10, 0.0  ;;  %v120_v27 = vmul.f32 %v61_v59, %v61_v59  ;;  %v142_v28 = vsel %vm67_vm1, %v118_v15, 0.0  ;;  %v181_v15 = vld [vmem:[%s435_s2] sm:$0x1] }
  0x1a   :  { %v137_v12 = vadd.f32 %v136_v9, %v135_v5  ;;  %v95_v29 = vsel %vm67_vm1, %v64_v17, 0.0  ;;  %v121_v32 = vmul.f32 %v62_v2, %v62_v2  ;;  %v144_v33 = vsel %vm67_vm1, %v119_v21, 0.0 }
  0x1b   :  { %v84_v56 = vadd.f32 %v83_v53, %v82_v49  ;;  %v97_v34 = vsel %vm67_vm1, %v65_v23, 0.0  ;;  %v122_v37 = vmul.f32 %v63_v10, %v63_v10  ;;  %v146_v4 = vsel %vm67_vm1, %v120_v27, 0.0  ;;  %v176_v10 = vld [vmem:[%s434_s1] sm:$0x1] }
  0x1c   :  { %v139_v19 = vadd.f32 %v138_v16, %v137_v12  ;;  %v123_v40 = vmul.f32 %v64_v17, %v64_v17  ;;  %v148_v41 = vsel %vm67_vm1, %v121_v32, 0.0  ;;  %v124_v44 = vmul.f32 %v65_v23, %v65_v23  ;;  %v174_v12 = vld [vmem:[#allocation4] sm:$0x1] }
  0x1d   :  { %v86_v63 = vadd.f32 %v85_v60, %v84_v56  ;;  %v150_v45 = vsel %vm67_vm1, %v122_v37, 0.0 }
  0x1e   :  { %v141_v25 = vadd.f32 %v140_v22, %v139_v19  ;;  %v152_v48 = vsel %vm67_vm1, %v123_v40, 0.0  ;;  %v154_v51 = vsel %vm67_vm1, %v124_v44, 0.0 }
  0x1f   :  { %v88_v7 = vadd.f32 %v87_v3, %v86_v63 }
  0x20   :  { %v143_v30 = vadd.f32 %v142_v28, %v141_v25 }
  0x21   :  { %v90_v14 = vadd.f32 %v89_v11, %v88_v7 }
  0x22   :  { %v145_v35 = vadd.f32 %v144_v33, %v143_v30 }
  0x23   :  { %v92_v20 = vadd.f32 %v91_v18, %v90_v14 }
  0x24   :  { %v147_v38 = vadd.f32 %v146_v4, %v145_v35 }
  0x25   :  { %v94_v26 = vadd.f32 %v93_v24, %v92_v20 }
  0x26   :  { %v149_v42 = vadd.f32 %v148_v41, %v147_v38 }
  0x27   :  { %v96_v31 = vadd.f32 %v95_v29, %v94_v26 }
  0x28   :  { %v151_v46 = vadd.f32 %v150_v45, %v149_v42 }
  0x29   :  { %v98_v36 = vadd.f32 %v97_v34, %v96_v31 }
  0x2a   :  { %v153_v49 = vadd.f32 %v152_v48, %v151_v46 }
  0x2b   :  { %v99_v39 = vrot.slane %v98_v36, 4 }
  0x2c   :  { %v155_v52 = vadd.f32 %v154_v51, %v153_v49 }
  0x2d   :  { %v100_v43 = vadd.f32 %v99_v39, %v98_v36 }
  0x2e   :  { %v156_v55 = vrot.slane %v155_v52, 4 }
  0x2f   :  { %v101_v47 = vrot.slane %v100_v43, 2 }
  0x30   :  { %v157_v57 = vadd.f32 %v156_v55, %v155_v52 }
  0x31   :  { %v102_v50 = vadd.f32 %v101_v47, %v100_v43 }
  0x32   :  { %v158_v59 = vrot.slane %v157_v57, 2 }
  0x33   :  { %v103_v53 = vrot.slane %v102_v50, 1 }
  0x34   :  { %v159_v60 = vadd.f32 %v158_v59, %v157_v57 }
  0x35   :  { %v104_v56 = vadd.f32 %v103_v53, %v102_v50 }
  0x36   :  { %v160_v61 = vrot.slane %v159_v60, 1 }
  0x37   :  { %v105_v58 = vadd.f32 %v104_v56, %v66_v54 }
  0x38   :  { %v161_v63 = vadd.f32 %v160_v61, %v159_v60 }
  0x39   :  { %107 = vst.msk [vmem:[#allocation2] sm:$0x1] %vm23_vm0, %v105_v58 }
  0x3a   :  { %v162_v0 = vadd.f32 %v161_v63, %v108_v62 }
  0x3c   :  { %163 = vst.msk [vmem:[#allocation3] sm:$0x1] %vm23_vm0, %v162_v0 }
  0x40   :  { %v167_v1 = vld [vmem:[#allocation2] sm:$0x1] }
  0x41   :  { %v168_v2 = vmul.f32 0.0078125, %v167_v1 }
  0x43   :  { %v171_v3 = vmul.f32 %v168_v2, %v168_v2  ;;  %v169_v5 = vld [vmem:[#allocation3] sm:$0x1]  ;;  %v175_v14 = vadd.f32 %v174_v12, %v168_v2 }
  0x44   :  { %v170_v6 = vmul.f32 0.0078125, %v169_v5 }
  0x46   :  { %v172_v7 = vsub.f32 %v170_v6, %v171_v3 }
  0x48   :  { %v173_v8 = vmax.f32 %v172_v7, 0.0 }
  0x4a   :  { %v177_v9 = vadd.f32 1e-05, %v173_v8 }
  0x4c   :  { %217 = vrsqrt.f32 %v177_v9 }
  0x56   :  { %v218_v11 = vpop.eup %217 }
  0x57   :  { %v179_v13 = vmul.f32 %v218_v11, %v176_v10 }
  0x59   :  { %180 = vst.msk [vmem:[#allocation5] sm:$0x1] %vm23_vm0, %v179_v13  ;;  %v182_v16 = vmul.f32 %v179_v13, %v175_v14 }
  0x5a   :  { %230 = shalt.err (!%p227_p4)
}
  0x5b   :  { %s231_s7 = scalar_lea.hbm %s436_s3, 16 }
  0x5c   :  { %p232_p5 = scmp.ne.s32.totalorder %s436_s3, %s231_s7  ;;  %p235_p6 = scmp.lt.u32.totalorder %s231_s7, %s436_s3 }
  0x5e   :  { %p237_p7 = pnand %p235_p6, %p232_p5 }
  0x60   :  { %240 = shalt.err (!%p237_p7)
}
  0x61   :  { %194 = dma.vmem_to_hbm [thread:$0]  %s192_s25, 16, %s436_s3, [#allocation6]   ;;  %v183_v17 = vsub.f32 %v181_v15, %v182_v16 }
  0x62   :  { %s241_s13 = scalar_lea.vmem %s202_s29, 16  ;;  %s245_s14 = scalar_lea.vmem %s202_s29, 32 }
  0x63   :  { %184 = vst.msk [vmem:[#allocation7] sm:$0x1] %vm23_vm0, %v183_v17  ;;  %p242_p8 = scmp.ne.s32.totalorder %s202_s29, %s241_s13  ;;  %p246_p9 = scmp.lt.s32.totalorder %s202_s29, %s202_s29 }
  0x64   :  { %p247_p10 = scmp.lt.s32.totalorder %s245_s14, %s241_s13 }
  0x66   :  { %p248_p11 = por %p247_p10, %p246_p9 }
  0x68   :  { %p249_p12 = pnand %p248_p11, %p242_p8 }
  0x6a   :  { %252 = shalt.err (!%p249_p12)
}
  0x6b   :  { %s253_s17 = scalar_lea.hbm %s437_s4, 16 }
  0x6c   :  { %p254_p13 = scmp.ne.s32.totalorder %s437_s4, %s253_s17  ;;  %p257_p0 = scmp.lt.u32.totalorder %s253_s17, %s437_s4 }
  0x6e   :  { %p259_p1 = pnand %p257_p0, %p254_p13 }
  0x70   :  { %262 = shalt.err (!%p259_p1)
}
  0x71   :  { %204 = dma.vmem_to_hbm [thread:$0]  %s202_s29, 16, %s437_s4, [#allocation8]  }
  0x72   :  { %263 = dma.done.wait [#allocation6], 16  }
  0x73   :  { %264 = vsyncadd [#allocation6], 4294967280 }
  0x74   :  { %265 = dma.done.wait [#allocation8], 16  }
  0x75   :  { %266 = vsyncadd [#allocation8], 4294967280 }
  0x76   :  { %211 = vsyncpa [#allocation6], 1 }
  0x77   :  { %212 = vsyncpa [#allocation8], 1 }

</bundles_post_ra>
